<compile_context>
chip_gen: v5e
topology: v5e:2x2
jax: 0.10.0
libtpu: 0.0.40
codegen_flags: <defaults>
</compile_context>

<pallas_src>
import functools

import jax
import jax.numpy as jnp
import numpy as np
from jax import lax
from jax.experimental import pallas as pl
from jax.experimental.pallas import tpu as pltpu


# ----------------------------------------------------------------------------
# Pass 1: conv (single im2col matmul per tile) + per-lane sum / sum-of-squares
# ----------------------------------------------------------------------------
def _conv_stats_kernel(p_ref, w_ref, y_ref, sum_ref, ssq_ref):
    i = pl.program_id(0)

    # (tile, K2) @ (K2, 128) -> (tile, 128); 128 lanes = 2 pixels x 64 channels.
    y = jnp.dot(p_ref[...], w_ref[...], preferred_element_type=jnp.float32)
    y_ref[...] = y  # lane-dense store

    @pl.when(i == 0)
    def _init():
        sum_ref[...] = jnp.zeros_like(sum_ref)
        ssq_ref[...] = jnp.zeros_like(ssq_ref)

    # One-pass statistics (E[x] and E[x^2]) accumulated into resident outputs.
    sum_ref[...] += jnp.sum(y, axis=0, keepdims=True)
    ssq_ref[...] += jnp.sum(y * y, axis=0, keepdims=True)


def _conv_stats_call(rows_p, tile, k2, c2):
    return pl.pallas_call(
        _conv_stats_kernel,
        out_shape=(
            jax.ShapeDtypeStruct((rows_p, c2), jnp.float32),
            jax.ShapeDtypeStruct((1, c2), jnp.float32),
            jax.ShapeDtypeStruct((1, c2), jnp.float32),
        ),
        grid=(rows_p // tile,),
        in_specs=[
            pl.BlockSpec((tile, k2), lambda i: (i, 0)),
            pl.BlockSpec((k2, c2), lambda i: (0, 0)),
        ],
        out_specs=(
            pl.BlockSpec((tile, c2), lambda i: (i, 0)),
            pl.BlockSpec((1, c2), lambda i: (0, 0)),   # resident accumulator
            pl.BlockSpec((1, c2), lambda i: (0, 0)),   # resident accumulator
        ),
        compiler_params=pltpu.CompilerParams(
            dimension_semantics=("arbitrary",)),
    )


# ----------------------------------------------------------------------------
# Pass 2: folded BatchNorm (scale/shift) + LeakyReLU, fully parallel tiles
# ----------------------------------------------------------------------------
def _bn_act_kernel(neg_slope, y_ref, scale_ref, shift_ref, out_ref):
    y = y_ref[...] * scale_ref[...] + shift_ref[...]
    out_ref[...] = jnp.maximum(y, neg_slope * y)


def _bn_act_call(rows_p, tile, c2, neg_slope):
    return pl.pallas_call(
        functools.partial(_bn_act_kernel, neg_slope),
        out_shape=jax.ShapeDtypeStruct((rows_p, c2), jnp.float32),
        grid=(rows_p // tile,),
        in_specs=[
            pl.BlockSpec((tile, c2), lambda i: (i, 0)),
            pl.BlockSpec((1, c2), lambda i: (0, 0)),
            pl.BlockSpec((1, c2), lambda i: (0, 0)),
        ],
        out_specs=pl.BlockSpec((tile, c2), lambda i: (i, 0)),
        compiler_params=pltpu.CompilerParams(
            dimension_semantics=("parallel",)),
    )


# ----------------------------------------------------------------------------
# Wrapper: matches PyTorch FirstBlock.forward (NCHW in / NCHW out)
# ----------------------------------------------------------------------------
def first_block_forward(x_nchw, w_oihw, gamma, beta, *,
                        eps=1e-5, neg_slope=0.2, tile_rows=512):
    N, Cin, H, W = x_nchw.shape
    Cout = int(w_oihw.shape[0])
    K = 9 * Cin                       # im2col contraction per pixel
    NHW = N * H * W
    assert NHW % 2 == 0, "N*H*W must be even for 2-pixel lane packing"
    rows = NHW // 2                   # packed rows: 2 pixels per row
    c2 = 2 * Cout                     # 128 output lanes
    k2 = ((2 * K + 7) // 8) * 8       # sublane-aligned contraction size

    # TODO(synk): NCHW<->NHWC transposes + zero padding stay in XLA to match
    # the PyTorch interface; fold into the producer if the model is kept NHWC.
    x = jnp.transpose(x_nchw, (0, 2, 3, 1)).astype(jnp.float32)   # NHWC
    xp = jnp.pad(x, ((0, 0), (1, 1), (1, 1), (0, 0)))

    # im2col in the wrapper: per pixel 27 values (tap-major, channel-minor),
    # then pack two consecutive pixels per row (pure contiguous reshape).
    taps = [xp[:, dh:dh + H, dw:dw + W, :] for dh in range(3) for dw in range(3)]
    patches = jnp.concatenate(taps, axis=-1).reshape(rows, 2 * K)

    # Row tile (multiple of 8); pad with zero rows — zero patches contribute
    # nothing to the BN sums, and padded output rows are sliced off below.
    tile = min(int(tile_rows), ((rows + 7) // 8) * 8)
    tile = max(8, (tile // 8) * 8)
    rows_p = ((rows + tile - 1) // tile) * tile
    patches = jnp.pad(patches, ((0, rows_p - rows), (0, k2 - 2 * K)))

    # Block-diagonal weight (k2, 2*Cout): lanes [0:Cout] -> even pixel,
    # lanes [Cout:2*Cout] -> odd pixel.
    w_flat = jnp.transpose(w_oihw, (2, 3, 1, 0)).astype(jnp.float32).reshape(K, Cout)
    w2 = jnp.zeros((k2, c2), jnp.float32)
    w2 = w2.at[:K, :Cout].set(w_flat).at[K:2 * K, Cout:].set(w_flat)

    conv2, s2, q2 = _conv_stats_call(rows_p, tile, k2, c2)(patches, w2)

    # Fold train-mode BatchNorm (biased batch variance) into scale/shift.
    s = s2[0, :Cout] + s2[0, Cout:]
    q = q2[0, :Cout] + q2[0, Cout:]
    mean = s / NHW
    var = q / NHW - mean * mean
    scale = lax.rsqrt(var + eps) * gamma.astype(jnp.float32)
    shift = beta.astype(jnp.float32) - mean * scale
    scale2 = jnp.tile(scale, 2).reshape(1, c2)
    shift2 = jnp.tile(shift, 2).reshape(1, c2)

    y2 = _bn_act_call(rows_p, tile, c2, neg_slope)(conv2, scale2, shift2)

    y = y2[:rows].reshape(N, H, W, Cout)   # contiguous unpack, bit-identical
    return jnp.transpose(y, (0, 3, 1, 2))  # back to NCHW


# ----------------------------------------------------------------------------
# Pure-JAX reference (same semantics as the PyTorch module in train mode)
# ----------------------------------------------------------------------------
def reference_forward(x_nchw, w_oihw, gamma, beta, eps=1e-5, neg_slope=0.2):
    y = lax.conv_general_dilated(
        x_nchw.astype(jnp.float32), w_oihw.astype(jnp.float32),
        window_strides=(1, 1), padding=((1, 1), (1, 1)),
        dimension_numbers=("NCHW", "OIHW", "NCHW"))
    mean = jnp.mean(y, axis=(0, 2, 3), keepdims=True)
    var = jnp.mean((y - mean) ** 2, axis=(0, 2, 3), keepdims=True)
    y = (y - mean) * lax.rsqrt(var + eps)
    y = y * gamma.reshape(1, -1, 1, 1) + beta.reshape(1, -1, 1, 1)
    return jnp.where(y >= 0, y, neg_slope * y)


if __name__ == "__main__":
    key = jax.random.PRNGKey(0)
    k_x, k_w = jax.random.split(key)

    N, Cin, H, W = 2, 3, 16, 16
    Cout = 64

    x = jax.random.normal(k_x, (N, Cin, H, W), dtype=jnp.float32)

    # Conv weight (Cout, Cin, 3, 3); BN gamma=1, beta=0 (PyTorch defaults).
    fan_in = Cin * 3 * 3
    bound = 1.0 / np.sqrt(fan_in)
    w = jax.random.uniform(k_w, (Cout, Cin, 3, 3), dtype=jnp.float32,
                           minval=-bound, maxval=bound)
    gamma = jnp.ones((Cout,), dtype=jnp.float32)
    beta = jnp.zeros((Cout,), dtype=jnp.float32)

    # tile_rows=128 -> grid of 2 tiles at this small demo size (exercises the
    # accumulator path); production shapes use the default 512-row tiles.
    out = jax.block_until_ready(
        first_block_forward(x, w, gamma, beta, tile_rows=128))
    ref = jax.block_until_ready(reference_forward(x, w, gamma, beta))

    np.testing.assert_allclose(np.asarray(out), np.asarray(ref),
                               rtol=1e-4, atol=1e-4)
    print("KERNEL_OK")
</pallas_src>

<mosaic_0001>
module attributes {stable_mosaic.version = 11 : i64} {
  func.func @_conv_stats_kernel(%arg0: i32, %arg1: memref<128x56xf32, #tpu.memory_space<vmem>>, %arg2: memref<56x128xf32, #tpu.memory_space<vmem>>, %arg3: memref<128x128xf32, #tpu.memory_space<vmem>>, %arg4: memref<1x128xf32, #tpu.memory_space<vmem>>, %arg5: memref<1x128xf32, #tpu.memory_space<vmem>>) attributes {dimension_semantics = [#tpu.dimension_semantics<arbitrary>], iteration_bounds = array<i64: 2>, scalar_prefetch = 0 : i64, scratch_operands = 0 : i64, tpu.core_type = #tpu.core_type<tc>, window_params = [{transform_indices = @transform_0, window_bounds = array<i64: 128, 56>}, {pipeline_mode = #tpu.pipeline_mode<synchronous>, transform_indices = @transform_1, window_bounds = array<i64: 56, 128>}, {transform_indices = @transform_2, window_bounds = array<i64: 128, 128>}, {pipeline_mode = #tpu.pipeline_mode<synchronous>, transform_indices = @transform_3, window_bounds = array<i64: 1, 128>}, {pipeline_mode = #tpu.pipeline_mode<synchronous>, transform_indices = @transform_4, window_bounds = array<i64: 1, 128>}]} {
    %c0 = arith.constant 0 : index
    %c0_0 = arith.constant 0 : index
    %0 = vector.load %arg1[%c0, %c0_0] : memref<128x56xf32, #tpu.memory_space<vmem>>, vector<128x56xf32>
    %c0_1 = arith.constant 0 : index
    %c0_2 = arith.constant 0 : index
    %1 = vector.load %arg2[%c0_1, %c0_2] : memref<56x128xf32, #tpu.memory_space<vmem>>, vector<56x128xf32>
    %cst = arith.constant dense<0.000000e+00> : vector<128x128xf32>
    %2 = tpu.matmul %0, %1, %cst {dimension_numbers = #tpu.dot_dimension_numbers<[1], [0], [0], [1], [0, 0, 1, 1], [], []>} : vector<128x56xf32>, vector<56x128xf32>, vector<128x128xf32> -> vector<128x128xf32>
    %c0_3 = arith.constant 0 : index
    %c0_4 = arith.constant 0 : index
    %3 = vector.load %arg3[%c0_3, %c0_4] : memref<128x128xf32, #tpu.memory_space<vmem>>, vector<128x128xf32>
    tpu.vector_store %arg3[%c0_3, %c0_4], %2 {strides = array<i32>} : memref<128x128xf32, #tpu.memory_space<vmem>>, vector<128x128xf32>,
    %c0_i32 = arith.constant 0 : i32
    %4 = arith.cmpi eq, %arg0, %c0_i32 : i32
    %5 = arith.extui %4 : i1 to i32
    %c0_i32_5 = arith.constant 0 : i32
    %6 = arith.cmpi ne, %5, %c0_i32_5 : i32
    scf.if %6 {
      %cst_16 = arith.constant 0.000000e+00 : f32
      %18 = vector.broadcast %cst_16 : f32 to vector<1x128xf32>
      %c0_17 = arith.constant 0 : index
      %c0_18 = arith.constant 0 : index
      %19 = vector.load %arg4[%c0_17, %c0_18] : memref<1x128xf32, #tpu.memory_space<vmem>>, vector<1x128xf32>
      tpu.vector_store %arg4[%c0_17, %c0_18], %18 {strides = array<i32>} : memref<1x128xf32, #tpu.memory_space<vmem>>, vector<1x128xf32>,
      %cst_19 = arith.constant 0.000000e+00 : f32
      %20 = vector.broadcast %cst_19 : f32 to vector<1x128xf32>
      %c0_20 = arith.constant 0 : index
      %c0_21 = arith.constant 0 : index
      %21 = vector.load %arg5[%c0_20, %c0_21] : memref<1x128xf32, #tpu.memory_space<vmem>>, vector<1x128xf32>
      tpu.vector_store %arg5[%c0_20, %c0_21], %20 {strides = array<i32>} : memref<1x128xf32, #tpu.memory_space<vmem>>, vector<1x128xf32>,
    } else {
    }
    %c0_6 = arith.constant 0 : index
    %c0_7 = arith.constant 0 : index
    %7 = vector.load %arg4[%c0_6, %c0_7] : memref<1x128xf32, #tpu.memory_space<vmem>>, vector<1x128xf32>
    %cst_8 = arith.constant dense<0.000000e+00> : vector<128xf32>
    %8 = vector.multi_reduction <add>, %2, %cst_8 [0] : vector<128x128xf32> to vector<128xf32>
    %9 = vector.shape_cast %8 : vector<128xf32> to vector<1x128xf32>
    %10 = arith.addf %7, %9 : vector<1x128xf32>
    %c0_9 = arith.constant 0 : index
    %c0_10 = arith.constant 0 : index
    %11 = vector.load %arg4[%c0_9, %c0_10] : memref<1x128xf32, #tpu.memory_space<vmem>>, vector<1x128xf32>
    tpu.vector_store %arg4[%c0_9, %c0_10], %10 {strides = array<i32>} : memref<1x128xf32, #tpu.memory_space<vmem>>, vector<1x128xf32>,
    %c0_11 = arith.constant 0 : index
    %c0_12 = arith.constant 0 : index
    %12 = vector.load %arg5[%c0_11, %c0_12] : memref<1x128xf32, #tpu.memory_space<vmem>>, vector<1x128xf32>
    %13 = arith.mulf %2, %2 : vector<128x128xf32>
    %cst_13 = arith.constant dense<0.000000e+00> : vector<128xf32>
    %14 = vector.multi_reduction <add>, %13, %cst_13 [0] : vector<128x128xf32> to vector<128xf32>
    %15 = vector.shape_cast %14 : vector<128xf32> to vector<1x128xf32>
    %16 = arith.addf %12, %15 : vector<1x128xf32>
    %c0_14 = arith.constant 0 : index
    %c0_15 = arith.constant 0 : index
    %17 = vector.load %arg5[%c0_14, %c0_15] : memref<1x128xf32, #tpu.memory_space<vmem>>, vector<1x128xf32>
    tpu.vector_store %arg5[%c0_14, %c0_15], %16 {strides = array<i32>} : memref<1x128xf32, #tpu.memory_space<vmem>>, vector<1x128xf32>,
    return
  }
  func.func @transform_0(%arg0: i32) -> (i32, i32) {
    %c0_i32 = arith.constant 0 : i32
    %c0_i32_0 = arith.constant 0 : i32
    return %arg0, %c0_i32 : i32, i32
  }
  func.func @transform_1(%arg0: i32) -> (i32, i32) {
    %c0_i32 = arith.constant 0 : i32
    %c0_i32_0 = arith.constant 0 : i32
    %c0_i32_1 = arith.constant 0 : i32
    return %c0_i32, %c0_i32_0 : i32, i32
  }
  func.func @transform_2(%arg0: i32) -> (i32, i32) {
    %c0_i32 = arith.constant 0 : i32
    %c0_i32_0 = arith.constant 0 : i32
    return %arg0, %c0_i32 : i32, i32
  }
  func.func @transform_3(%arg0: i32) -> (i32, i32) {
    %c0_i32 = arith.constant 0 : i32
    %c0_i32_0 = arith.constant 0 : i32
    %c0_i32_1 = arith.constant 0 : i32
    return %c0_i32, %c0_i32_0 : i32, i32
  }
  func.func @transform_4(%arg0: i32) -> (i32, i32) {
    %c0_i32 = arith.constant 0 : i32
    %c0_i32_0 = arith.constant 0 : i32
    %c0_i32_1 = arith.constant 0 : i32
    return %c0_i32, %c0_i32_0 : i32, i32
  }
}

</mosaic_0001>

<bundles_post_ra>
// kernel: tpu_custom_call.1
= control target key start
LH: loop header
LB: loop body
LE: loop exit
PB: predicated region body
PF: predicated region fallthrough
CT: control target
= control target key end

     0   :  { %10 = vsyncpa [#allocation3], 0  ;;  %s1029_s0 = inlined_call_operand.vmem [shape: f32[256,56], index: 0, kind: input, shape index: {}]   ;;  %s1030_s1 = inlined_call_operand.vmem [shape: f32[56,128], index: 1, kind: input, shape index: {}]   ;;  %s1031_s2 = inlined_call_operand.hbm [shape: f32[256,128], index: 2, kind: output, shape index: {0}]   ;;  %s1032_s3 = inlined_call_operand.hbm [shape: f32[1,128], index: 3, kind: output, shape index: {1}]   ;;  %s1033_s4 = inlined_call_operand.hbm [shape: f32[1,128], index: 4, kind: output, shape index: {2}]  }
   0x1   :  { %12 = vsyncpa [#allocation3 + $0x1], 0 }
   0x2   :  { %13 = vsyncpa [#allocation5], 0  ;;  %s808_s15 = smov 0   ;;  %s810_s16 = smov 0  }
   0x3   :  { %s812_s17 = smov 0   ;;  %s814_s18 = smov 0  }
   0x4 LB: > { %s829_s19 = sadd.s32 4294967295, %s776_s18   ;;  %s543_s20 = sadd.s32 4294967294, %s776_s18   ;;  %s776_s18 = sphi %s814_s18, %s1039_s18   ;;  %s772_s17 = sphi %s812_s17, %s1038_s17   ;;  %s768_s16 = sphi %s810_s16, %s1037_s16   ;;  %s764_s15 = sphi %s808_s15, %s1036_s15  }
   0x5   : > { %s833_s21 = sadd.s32 1, %s776_s18   ;;  %s73_s22 = sadd.s32 1, %s772_s17 }
   0x6   : > { %s70_s23 = ssub.s32 %s776_s18, %s833_s21  ;;  %p83_p0 = scmp.ne.s32.totalorder %s772_s17, %s768_s16 }
   0x7   : > { %p71_p1 = scmp.eq.s32.totalorder %s70_s23, 0  ;;  %p84_p2 = scmp.eq.s32.totalorder %s829_s19, 1 }
   0x8   : > { %p89_p3 = scmp.ne.s32.totalorder %s768_s16, %s764_s15  ;;  %p90_p4 = scmp.eq.s32.totalorder %s543_s20, 1 }
   0x9   : > { %s844_s24 = scalar_select %p71_p1, %s772_s17, %s73_s22  }
   0xa   : > { %p848_p5 = por %p84_p2, %p83_p0  ;;  %p852_p6 = por %p90_p4, %p89_p3 }
   0xb   : > { %p546_p7 = scmp.ge.s32.totalorder %s776_s18, 1  ;;  %p162_p8 = scmp.lt.s32.totalorder %s776_s18, 3 }
   0xd   : > { %p163_p9 = pnand %p546_p7, %p162_p8 }
   0xe   : > { %s548_s5 = sshll.u32 (!%p163_p9), %s829_s19, 4  ;;  %s181_s29 = sand.u32 (!%p163_p9), 1, %s768_s16  }
   0xf   : > { %166 = sbr.rel (%p163_p9) target bundleno = 251 (0xfb), region = 28  ;;  %p189_p10 = scmp.lt.s32.totalorder (!%p163_p9), %s548_s5, 31 }
  0x10   : > { %s547_s30 = sshll.u32 (!%p163_p9), %s181_s29, 7  ;;  %p566_p11 = scmp.ne.s32.totalorder (!%p163_p9), %s829_s19, 0 }
  0x14   : > { %v217_v0 = vld [vmem:[%s1030_s1 + $0x30] sm:$0xff]  ;;  %v216_v1 = vld [vmem:[%s1030_s1 + $0x28] sm:$0xff]  ;;  %v215_v2 = vld [vmem:[%s1030_s1 + $0x20] sm:$0xff]  ;;  %s1041_s5 = smov (!%p189_p10, %s548_s5), 31  ;;  %vm218_vm0 = vcmask 457728  }
  0x15   : > { %578 = vmatpush.msra.mxu2 %v217_v0  ;;  %579 = vmatpush.msra.mxu3 %v217_v0  ;;  %v214_v3 = vld [vmem:[%s1030_s1 + $0x18] sm:$0xff]  ;;  %s549_s10 = sshll.u32 %s1041_s5, 3  ;;  %v213_v4 = vld [vmem:[%s1030_s1 + $0x10] sm:$0xff]  ;;  %v212_v5 = vld [vmem:[%s1030_s1 + $0x8] sm:$0xff]  ;;  %s920_s5 = scalar_lea.vmem [#allocation2], %s547_s30 }
  0x16   : > { %276 = vmatpush.msra.mxu0 %v217_v0  ;;  %577 = vmatpush.msra.mxu1 %v217_v0  ;;  %s880_s23 = scalar_lea.vmem %s1029_s0, %s549_s10  ;;  %v211_v6 = vld [vmem:[%s1030_s1] sm:$0xff] }
  0x17   : > { %581 = vmatpush.msra.mxu2 %v216_v1  ;;  %582 = vmatpush.msra.mxu3 %v216_v1  ;;  %v203_v7 = vld [vmem:[%s880_s23 + $0x40] sm:$0xff]  ;;  %v204_v11 = vld [vmem:[%s880_s23 + $0x48] sm:$0xff]  ;;  %v205_v15 = vld [vmem:[%s880_s23 + $0x50] sm:$0xff] }
  0x18   : > { %277 = vmatpush.msra.mxu0 %v216_v1  ;;  %580 = vmatpush.msra.mxu1 %v216_v1  ;;  %v207_v8 = vld [vmem:[%s880_s23 + $0x60] sm:$0xff]  ;;  %v208_v12 = vld [vmem:[%s880_s23 + $0x68] sm:$0xff]  ;;  %v209_v16 = vld [vmem:[%s880_s23 + $0x70] sm:$0xff] }
  0x19   : > { %584 = vmatpush.msra.mxu2 %v215_v2  ;;  %585 = vmatpush.msra.mxu3 %v215_v2  ;;  %v195_v9 = vld [vmem:[%s880_s23] sm:$0xff]  ;;  %v196_v13 = vld [vmem:[%s880_s23 + $0x8] sm:$0xff]  ;;  %v197_v17 = vld [vmem:[%s880_s23 + $0x10] sm:$0xff] }
  0x1a   : > { %278 = vmatpush.msra.mxu0 %v215_v2  ;;  %583 = vmatpush.msra.mxu1 %v215_v2  ;;  %v199_v10 = vld [vmem:[%s880_s23 + $0x20] sm:$0xff]  ;;  %v200_v14 = vld [vmem:[%s880_s23 + $0x28] sm:$0xff]  ;;  %v201_v18 = vld [vmem:[%s880_s23 + $0x30] sm:$0xff] }
  0x1b   : > { %587 = vmatpush.msra.mxu2 %v214_v3  ;;  %588 = vmatpush.msra.mxu3 %v214_v3  ;;  %v206_v19 = vld [vmem:[%s880_s23 + $0x58] sm:$0xff] }
  0x1c   : > { %279 = vmatpush.msra.mxu0 %v214_v3  ;;  %586 = vmatpush.msra.mxu1 %v214_v3  ;;  %v210_v20 = vld [vmem:[%s880_s23 + $0x78] sm:$0xff] }
  0x1d   : > { %590 = vmatpush.msra.mxu2 %v213_v4  ;;  %591 = vmatpush.msra.mxu3 %v213_v4  ;;  %v198_v21 = vld [vmem:[%s880_s23 + $0x18] sm:$0xff] }
  0x1e   : > { %280 = vmatpush.msra.mxu0 %v213_v4  ;;  %589 = vmatpush.msra.mxu1 %v213_v4  ;;  %v202_v22 = vld [vmem:[%s880_s23 + $0x38] sm:$0xff] }
  0x1f   : > { %593 = vmatpush.msra.mxu2 %v212_v5  ;;  %594 = vmatpush.msra.mxu3 %v212_v5 }
  0x20   : > { %281 = vmatpush.msra.mxu0 %v212_v5  ;;  %592 = vmatpush.msra.mxu1 %v212_v5 }
  0x21   : > { %596 = vmatpush.msra.mxu2 %v211_v6  ;;  %597 = vmatpush.msra.mxu3 %v211_v6 }
  0x22   : > { %558 = vmatmul.msk.f32.vlgmr.msra.gmra.mxu2 %vm218_vm0, %v203_v7  ;;  %562 = vmatmul.msk.f32.vlgmr.msra.gmra.mxu3 %vm218_vm0, %v207_v8 }
  0x23   : > { %282 = vmatpush.msra.mxu0 %v211_v6  ;;  %595 = vmatpush.msra.mxu1 %v211_v6 }
  0x24   : > { %550 = vmatmul.msk.f32.vlgmr.msra.gmra.mxu0 %vm218_vm0, %v195_v9  ;;  %554 = vmatmul.msk.f32.vlgmr.msra.gmra.mxu1 %vm218_vm0, %v199_v10 }
  0x2a   : > { %559 = vmatmul.msk.f32.gmra.mxu2 %vm218_vm0, %v204_v11  ;;  %563 = vmatmul.msk.f32.gmra.mxu3 %vm218_vm0, %v208_v12 }
  0x2c   : > { %551 = vmatmul.msk.f32.gmra.mxu0 %vm218_vm0, %v196_v13  ;;  %555 = vmatmul.msk.f32.gmra.mxu1 %vm218_vm0, %v200_v14 }
  0x32   : > { %560 = vmatmul.msk.f32.gmra.mxu2 %vm218_vm0, %v205_v15  ;;  %564 = vmatmul.msk.f32.gmra.mxu3 %vm218_vm0, %v209_v16 }
  0x34   : > { %552 = vmatmul.msk.f32.gmra.mxu0 %vm218_vm0, %v197_v17  ;;  %556 = vmatmul.msk.f32.gmra.mxu1 %vm218_vm0, %v201_v18 }
  0x3a   : > { %561 = vmatmul.msk.f32.gmra.mxu2 %vm218_vm0, %v206_v19  ;;  %565 = vmatmul.msk.f32.gmra.mxu3 %vm218_vm0, %v210_v20 }
  0x3c   : > { %553 = vmatmul.msk.f32.gmra.mxu0 %vm218_vm0, %v198_v21  ;;  %557 = vmatmul.msk.f32.gmra.mxu1 %vm218_vm0, %v202_v22 }
  0xa1   : > { %v284_v23 = vpop.f32.mrf.mxu0  ;;  %v296_v24 = vpop.f32.mrf.mxu1 }
  0xa2   : > { %332 = vst [vmem:[%s920_s5] sm:$0xff] %v284_v23 }
  0xa3   : > { %336 = vst [vmem:[%s920_s5 + $0x20] sm:$0xff] %v296_v24 }
  0xa5   : > { %v924_v25 = vpop.f32.mrf.mxu2  ;;  %v926_v26 = vpop.f32.mrf.mxu3 }
  0xa6   : > { %340 = vst [vmem:[%s920_s5 + $0x40] sm:$0xff] %v924_v25 }
  0xa7   : > { %344 = vst [vmem:[%s920_s5 + $0x60] sm:$0xff] %v926_v26 }
  0xa9   : > { %v287_v27 = vpop.f32.mrf.mxu0  ;;  %v299_v28 = vpop.f32.mrf.mxu1 }
  0xaa   : > { %333 = vst [vmem:[%s920_s5 + $0x8] sm:$0xff] %v287_v27 }
  0xab   : > { %337 = vst [vmem:[%s920_s5 + $0x28] sm:$0xff] %v299_v28 }
  0xad   : > { %v934_v29 = vpop.f32.mrf.mxu2  ;;  %v936_v30 = vpop.f32.mrf.mxu3 }
  0xae   : > { %341 = vst [vmem:[%s920_s5 + $0x48] sm:$0xff] %v934_v29 }
  0xaf   : > { %345 = vst [vmem:[%s920_s5 + $0x68] sm:$0xff] %v936_v30 }
  0xb1   : > { %v290_v31 = vpop.f32.mrf.mxu0  ;;  %v302_v32 = vpop.f32.mrf.mxu1 }
  0xb2   : > { %334 = vst [vmem:[%s920_s5 + $0x10] sm:$0xff] %v290_v31 }
  0xb3   : > { %338 = vst [vmem:[%s920_s5 + $0x30] sm:$0xff] %v302_v32 }
  0xb5   : > { %v944_v33 = vpop.f32.mrf.mxu2  ;;  %v946_v34 = vpop.f32.mrf.mxu3 }
  0xb6   : > { %342 = vst [vmem:[%s920_s5 + $0x50] sm:$0xff] %v944_v33 }
  0xb7   : > { %346 = vst [vmem:[%s920_s5 + $0x70] sm:$0xff] %v946_v34 }
  0xb9   : > { %v293_v35 = vpop.f32.mrf.mxu0  ;;  %v305_v36 = vpop.f32.mrf.mxu1 }
  0xba   : > { %335 = vst [vmem:[%s920_s5 + $0x18] sm:$0xff] %v293_v35 }
  0xbb   : > { %339 = vst [vmem:[%s920_s5 + $0x38] sm:$0xff] %v305_v36  ;;  %351 = sbr.rel (%p566_p11) target bundleno = 195 (0xc3), region = 32 }
  0xbd   : > { %v317_v37 = vpop.f32.mrf.mxu2  ;;  %v954_v38 = vpop.f32.mrf.mxu3 }
  0xbe   : > { %343 = vst [vmem:[%s920_s5 + $0x58] sm:$0xff] %v317_v37 }
  0xbf   : > { %347 = vst [vmem:[%s920_s5 + $0x78] sm:$0xff] %v954_v38 }
  0xc0   : > { %v778_v39 = vmov 0.0  }
  0xc1   : > { %352 = vst [vmem:[#allocation4] sm:$0x1] %v778_v39 }
  0xc2   : > { %353 = vst [vmem:[#allocation6] sm:$0x1] %v778_v39 }
  0xc3 PF: > { %v355_v40 = vadd.f32 %v287_v27, %v284_v23  ;;  %v379_v41 = vmul.f32 %v284_v23, %v284_v23  ;;  %v380_v42 = vmul.f32 %v287_v27, %v287_v27  ;;  %v381_v44 = vmul.f32 %v290_v31, %v290_v31  ;;  %s576_s6 = sshll.u32 %s829_s19, 7  ;;  %s431_s10 = sshll.u32 %s920_s5, 4  ;;  %s432_s10 = int_to_ptr.vmem [resolvable:$true] %s431_s10 }
  0xc4   : > { %v382_v46 = vmul.f32 %v293_v35, %v293_v35  ;;  %s430_s9 = scalar_lea.hbm %s1031_s2, %s576_s6  ;;  %v383_v49 = vmul.f32 %v296_v24, %v296_v24  ;;  %v384_v52 = vmul.f32 %v299_v28, %v299_v28  ;;  %s419_s12 = scalar_lea.sflag [#allocation3], %s181_s29 }
  0xc5   : > { %v356_v43 = vadd.f32 %v355_v40, %v290_v31  ;;  %v395_v47 = vadd.f32 %v380_v42, %v379_v41  ;;  %s433_s11 = sshll.u32 %s430_s9, 4  ;;  %s674_s23 = scalar_lea.hbm %s1031_s2, 256  ;;  %s434_s11 = int_to_ptr.hbm [resolvable:$true] %s433_s11 }
  0xc6   : > { %s668_s13 = sshra.s32 %s434_s11, 4  ;;  %s669_s13 = int_to_ptr.hbm [resolvable:$true] %s668_s13 }
  0xc7   : > { %v357_v45 = vadd.f32 %v356_v43, %v293_v35  ;;  %v396_v50 = vadd.f32 %v395_v47, %v381_v44  ;;  %s670_s14 = scalar_lea.hbm %s669_s13, 128  ;;  %p675_p1 = scmp.lt.s32.totalorder %s669_s13, %s1031_s2 }
  0xc8   : > { %p671_p12 = scmp.ne.s32.totalorder %s669_s13, %s670_s14  ;;  %p676_p3 = scmp.lt.s32.totalorder %s674_s23, %s670_s14 }
  0xc9   : > { %v358_v48 = vadd.f32 %v357_v45, %v296_v24  ;;  %v397_v53 = vadd.f32 %v396_v50, %v382_v46 }
  0xca   : > { %p672_p13 = pnand %p671_p12, %p848_p5  ;;  %p677_p4 = por %p676_p3, %p675_p1 }
  0xcb   : > { %v359_v51 = vadd.f32 %v358_v48, %v299_v28 }
  0xcc   : > { %p673_p0 = pneg %p672_p13 }
  0xce   : > { %p678_p7 = pnand %p677_p4, %p673_p0 }
  0xd0   : > { %681 = shalt.err (!%p678_p7)
}
  0xd1   : > { %s779_s29 = smov 128   ;;  %s780_s30 = smov 8   ;;  %v360_v54 = vadd.f32 %v359_v51, %v302_v32  ;;  %v385_v55 = vmul.f32 %v302_v32, %v302_v32  ;;  %v398_v56 = vadd.f32 %v397_v53, %v383_v49  ;;  %v386_v58 = vmul.f32 %v305_v36, %v305_v36  ;;  %v378_v35 = vld [vmem:[#allocation6] sm:$0x1] }
  0xd2   : > { %598 = dma.vmem_to_hbm [thread:$0]  (%p848_p5), %s432_s10, 2048, %s434_s11, %s419_s12, %s779_s29, %s779_s29, %s780_s30   ;;  %v387_v61 = vmul.f32 %v924_v25, %v924_v25  ;;  %v388_v0 = vmul.f32 %v934_v29, %v934_v29  ;;  %v389_v3 = vmul.f32 %v944_v33, %v944_v33  ;;  %v390_v6 = vmul.f32 %v317_v37, %v317_v37 }
  0xd3   : > { %v361_v57 = vadd.f32 %v360_v54, %v305_v36  ;;  %v399_v59 = vadd.f32 %v398_v56, %v384_v52  ;;  %v391_v9 = vmul.f32 %v926_v26, %v926_v26  ;;  %v392_v12 = vmul.f32 %v936_v30, %v936_v30  ;;  %s781_s25 = smov [#allocation4]   ;;  %s448_s8 = sshll.u32 %s1032_s3, 4  ;;  %s449_s8 = int_to_ptr.hbm [resolvable:$true] %s448_s8 }
  0xd4   : > { %v393_v15 = vmul.f32 %v946_v34, %v946_v34  ;;  %v394_v18 = vmul.f32 %v954_v38, %v954_v38  ;;  %s446_s5 = sshll.u32 %s781_s25, 4  ;;  %s782_s9 = smov [#allocation6]   ;;  %s447_s5 = int_to_ptr.vmem [resolvable:$true] %s446_s5 }
  0xd5   : > { %v362_v60 = vadd.f32 %v361_v57, %v924_v25  ;;  %v400_v62 = vadd.f32 %v399_v59, %v385_v55  ;;  %s458_s10 = sshll.u32 %s782_s9, 4  ;;  %s460_s13 = sshll.u32 %s1033_s4, 4  ;;  %s459_s10 = int_to_ptr.vmem [resolvable:$true] %s458_s10  ;;  %s461_s13 = int_to_ptr.hbm [resolvable:$true] %s460_s13 }
  0xd7   : > { %v363_v63 = vadd.f32 %v362_v60, %v934_v29  ;;  %v401_v1 = vadd.f32 %v400_v62, %v386_v58 }
  0xd9   : > { %v364_v2 = vadd.f32 %v363_v63, %v944_v33  ;;  %v402_v4 = vadd.f32 %v401_v1, %v387_v61 }
  0xdb   : > { %v365_v5 = vadd.f32 %v364_v2, %v317_v37  ;;  %v403_v7 = vadd.f32 %v402_v4, %v388_v0 }
  0xdd   : > { %v366_v8 = vadd.f32 %v365_v5, %v926_v26  ;;  %v404_v10 = vadd.f32 %v403_v7, %v389_v3 }
  0xdf   : > { %v367_v11 = vadd.f32 %v366_v8, %v936_v30  ;;  %v405_v13 = vadd.f32 %v404_v10, %v390_v6  ;;  %v354_v30 = vld [vmem:[#allocation4] sm:$0x1] }
  0xe1   : > { %v368_v14 = vadd.f32 %v367_v11, %v946_v34  ;;  %v406_v16 = vadd.f32 %v405_v13, %v391_v9 }
  0xe3   : > { %v369_v17 = vadd.f32 %v368_v14, %v954_v38  ;;  %v407_v19 = vadd.f32 %v406_v16, %v392_v12 }
  0xe5   : > { %v370_v20 = vrot.slane %v369_v17, 4  ;;  %v408_v21 = vadd.f32 %v407_v19, %v393_v15 }
  0xe7   : > { %v371_v22 = vadd.f32 %v370_v20, %v369_v17  ;;  %v409_v23 = vadd.f32 %v408_v21, %v394_v18 }
  0xe9   : > { %v372_v24 = vrot.slane %v371_v22, 2  ;;  %v410_v25 = vrot.slane %v409_v23, 4 }
  0xeb   : > { %v373_v26 = vadd.f32 %v372_v24, %v371_v22  ;;  %v411_v27 = vadd.f32 %v410_v25, %v409_v23 }
  0xed   : > { %v374_v28 = vrot.slane %v373_v26, 1  ;;  %v412_v29 = vrot.slane %v411_v27, 2 }
  0xef   : > { %v375_v31 = vadd.f32 %v374_v28, %v373_v26  ;;  %v413_v32 = vadd.f32 %v412_v29, %v411_v27 }
  0xf1   : > { %v376_v33 = vadd.f32 %v375_v31, %v354_v30  ;;  %v414_v34 = vrot.slane %v413_v32, 1 }
  0xf3   : > { %377 = vst [vmem:[#allocation4] sm:$0x1] %v376_v33  ;;  %v415_v36 = vadd.f32 %v414_v34, %v413_v32 }
  0xf4   : > { %600 = dma.vmem_to_hbm [thread:$0]  (%p84_p2), %s447_s5, 16, %s449_s8, [#allocation5]  }
  0xf5   : > { %v416_v37 = vadd.f32 %v415_v36, %v378_v35 }
  0xf7   : > { %417 = vst [vmem:[#allocation6] sm:$0x1] %v416_v37 }
  0xf8   : > { %602 = dma.vmem_to_hbm [thread:$0]  (%p84_p2), %s459_s10, 16, %s461_s13, [#allocation5]  }
  0xf9   : > { %755 = dma.done.wait (%p84_p2), [#allocation5], 32  }
  0xfa   : > { %757 = vsyncadd (%p84_p2), [#allocation5], 4294967264 }
  0xfb PF: > { %p616_p5 = scmp.ge.s32.totalorder %s776_s18, 2  ;;  %s482_s14 = sand.u32 1, %s764_s15  }
  0xfc   : > { %s483_s20 = scalar_lea.sflag [#allocation3], %s482_s14 }
  0xfd   : > { %p609_p8 = pnand %p616_p5, %p852_p6 }
  0xff   : > { %p610_p9 = pneg %p609_p8 }
 0x101   : > { %759 = dma.done.wait (%p610_p9), %s483_s20, 2048  }
 0x102   : > { %761 = vsyncadd (%p610_p9), %s483_s20, 4294965248  ;;  %p16_p10 = scmp.ge.s32.totalorder %s833_s21, 4   ;;  %s1036_s15 = smov %s768_s16 }
 0x103   : > { %s1037_s16 = smov %s772_s17  ;;  %s1038_s17 = smov %s844_s24 }
 0x104   : > { %s1039_s18 = smov %s833_s21  ;;  %18 = sbr.rel (!%p16_p10) target bundleno = 4 (0x4), region = 83 }
 0x109   :  { %489 = vsyncpa [#allocation3], 1 }
 0x10a   :  { %491 = vsyncpa [#allocation3 + $0x1], 1 }
 0x10b   :  { %492 = vsyncpa [#allocation5], 1 }

</bundles_post_ra>
